<compile_context>
chip_gen: v7x
topology: tpu7x:2x2x1
jax: 0.10.0
libtpu: 0.0.40
codegen_flags: <defaults>
</compile_context>

<pallas_src>
import functools

import numpy as np
import jax
import jax.numpy as jnp
from jax.experimental import pallas as pl
from jax.experimental.pallas import tpu as pltpu

EPS = 1e-5


def _output_layer_kernel(x_ref, scale_ref, shift_ref, wt_ref, b_ref, o_ref,
                         acc_ref, *, hw_total, thw, mask_spatial):
    """One grid step: accumulate ReLU(BN(x)) spatial sums; finalize at last HW step.

    x_ref:     (TB, C, THW) activation tile
    scale_ref: (C, 1)  folded BN scale   = gamma * rsqrt(var + eps)
    shift_ref: (C, 1)  folded BN shift   = beta - mean * scale
    wt_ref:    (C, K)  linear weight^T / (H*W)   (pooling folded in)
    b_ref:     (1, K)  linear bias
    o_ref:     (TB, K) output block
    acc_ref:   (TB, C) f32 accumulator scratch (persists across the HW axis)
    """
    hw_idx = pl.program_id(1)

    @pl.when(hw_idx == 0)
    def _init():
        acc_ref[...] = jnp.zeros_like(acc_ref)

    x = x_ref[...]                                   # (TB, C, THW)
    scale = scale_ref[...][None, :, :]               # (1, C, 1)
    shift = shift_ref[...][None, :, :]               # (1, C, 1)
    xr = jnp.maximum(x * scale + shift, 0.0)         # BN (folded) + ReLU on the VPU

    if mask_spatial:
        # Ragged last HW tile: zero out lanes past the true spatial extent so the
        # accumulated SUM (not a per-tile mean) stays exact.
        lane = jax.lax.broadcasted_iota(jnp.int32, x.shape, dimension=2)
        valid = (hw_idx * thw + lane) < hw_total
        xr = jnp.where(valid, xr, 0.0)

    acc_ref[...] += jnp.sum(xr, axis=-1)             # partial pooled sums (TB, C)

    @pl.when(hw_idx == pl.num_programs(1) - 1)
    def _finish():
        # Tiny (TB,C)@(C,K) matmul issued once per batch tile, not per HW step.
        out = jnp.dot(acc_ref[...], wt_ref[...],
                      preferred_element_type=jnp.float32)
        out = out + b_ref[...]
        o_ref[...] = out.astype(o_ref.dtype)


def _choose_spatial_tile(hw, tb, c, itemsize, budget_bytes=8 * 1024 * 1024):
    """Largest spatial tile (lane dim) whose x block fits the per-buffer budget."""
    max_elems = max(1, budget_bytes // max(1, tb * c * itemsize))
    max_thw = max(128, (max_elems // 128) * 128)
    if hw <= max_thw:
        return hw                       # whole spatial extent per step (block == full dim)
    if hw % 128 == 0:
        # prefer a multiple of 128 that divides HW exactly (no ragged tile)
        for t in range(max_thw, 127, -128):
            if hw % t == 0:
                return t
    return max_thw                      # ragged last tile handled by in-kernel mask


def output_layer(x, gamma, beta, running_mean, running_var, weight, bias,
                 output_shape, *, eps=EPS):
    """Pallas implementation of OutputLayer.forward (inference-mode BN).

    x: (B, C, H, W) float32 (NCHW, same as PyTorch).
    weight: (K, C), bias: (K,) with K = prod(output_shape).
    Returns (B, output_shape[0]).
    """
    B, C, H, W = x.shape
    HW = H * W
    K = int(np.prod(output_shape))
    assert K == int(output_shape[0]), \
        "reshape(bs, output_shape[0]) requires 1-D output_shape"

    # --- Fold BN into per-channel scale/shift; fold 1/(H*W) into the weight. ---
    inv_std = jax.lax.rsqrt(running_var.astype(jnp.float32) + eps)
    scale = (gamma.astype(jnp.float32) * inv_std).reshape(C, 1)
    shift = (beta.astype(jnp.float32)
             - running_mean.astype(jnp.float32) * scale[:, 0]).reshape(C, 1)
    wt = (weight.T.astype(jnp.float32) / float(HW)).reshape(C, K)
    bb = bias.astype(jnp.float32).reshape(1, K)

    # Flatten spatial dims so pooling is a lane-axis reduction.
    x3 = x.reshape(B, C, HW)

    # --- Tile sizes: keep double-buffered x tile well under scoped VMEM. ---
    TB = B if B <= 8 else 8
    THW = _choose_spatial_tile(HW, TB, C, x3.dtype.itemsize)
    mask_spatial = (HW % THW) != 0
    nb = pl.cdiv(B, TB)
    nh = pl.cdiv(HW, THW)

    kernel = functools.partial(_output_layer_kernel,
                               hw_total=HW, thw=THW, mask_spatial=mask_spatial)

    out = pl.pallas_call(
        kernel,
        out_shape=jax.ShapeDtypeStruct((B, K), x.dtype),
        grid_spec=pltpu.PrefetchScalarGridSpec(
            num_scalar_prefetch=0,
            grid=(nb, nh),
            in_specs=[
                pl.BlockSpec((TB, C, THW), lambda b, h: (b, 0, h)),  # activations
                pl.BlockSpec((C, 1), lambda b, h: (0, 0)),           # BN scale
                pl.BlockSpec((C, 1), lambda b, h: (0, 0)),           # BN shift
                pl.BlockSpec((C, K), lambda b, h: (0, 0)),           # W^T / HW
                pl.BlockSpec((1, K), lambda b, h: (0, 0)),           # bias
            ],
            out_specs=pl.BlockSpec((TB, K), lambda b, h: (b, 0)),
            scratch_shapes=[pltpu.VMEM((TB, C), jnp.float32)],
        ),
        compiler_params=pltpu.CompilerParams(
            dimension_semantics=("parallel", "arbitrary"),
            vmem_limit_bytes=40 * 1024 * 1024,
        ),
    )(x3, scale, shift, wt, bb)

    return out.reshape(B, int(output_shape[0]))


def _reference(x, gamma, beta, running_mean, running_var, weight, bias,
               output_shape):
    B, C, H, W = x.shape
    xn = (x - running_mean[None, :, None, None]) / jnp.sqrt(
        running_var[None, :, None, None] + EPS)
    xn = xn * gamma[None, :, None, None] + beta[None, :, None, None]
    xr = jnp.maximum(xn, 0.0)
    pooled = jnp.mean(xr, axis=(2, 3))          # AdaptiveAvgPool2d(1) + squeeze
    out = pooled @ weight.T + bias
    return out.reshape(B, int(output_shape[0]))


if __name__ == "__main__":
    B, C, H, W = 2, 4, 16, 16
    output_shape = (3,)
    K = int(np.prod(output_shape))

    key = jax.random.PRNGKey(0)
    kx, kg, kb, km, kv, kw, kbias = jax.random.split(key, 7)

    x = jax.random.normal(kx, (B, C, H, W), dtype=jnp.float32)
    gamma = jax.random.normal(kg, (C,), dtype=jnp.float32) * 0.1 + 1.0
    beta = jax.random.normal(kb, (C,), dtype=jnp.float32) * 0.1
    running_mean = jax.random.normal(km, (C,), dtype=jnp.float32) * 0.1
    running_var = jax.random.uniform(kv, (C,), dtype=jnp.float32,
                                     minval=0.5, maxval=1.5)
    weight = jax.random.normal(kw, (K, C), dtype=jnp.float32) * (1.0 / np.sqrt(C))
    bias = jax.random.normal(kbias, (K,), dtype=jnp.float32) * 0.1

    out = output_layer(x, gamma, beta, running_mean, running_var, weight, bias,
                       output_shape)
    out = jax.block_until_ready(out)

    ref = _reference(x, gamma, beta, running_mean, running_var, weight, bias,
                     output_shape)
    np.testing.assert_allclose(np.asarray(out), np.asarray(ref),
                               rtol=1e-5, atol=1e-5)
    print("KERNEL_OK")
</pallas_src>

<mosaic_0001>
module attributes {stable_mosaic.version = 11 : i64} {
  func.func @_output_layer_kernel(%arg0: i32, %arg1: i32, %arg2: memref<2x4x256xf32, #tpu.memory_space<vmem>>, %arg3: memref<4x1xf32, #tpu.memory_space<vmem>>, %arg4: memref<4x1xf32, #tpu.memory_space<vmem>>, %arg5: memref<4x3xf32, #tpu.memory_space<vmem>>, %arg6: memref<1x3xf32, #tpu.memory_space<vmem>>, %arg7: memref<2x3xf32, #tpu.memory_space<vmem>>, %arg8: memref<2x4xf32, #tpu.memory_space<vmem>>) attributes {dimension_semantics = [#tpu.dimension_semantics<parallel>, #tpu.dimension_semantics<arbitrary>], iteration_bounds = array<i64: 1, 1>, scalar_prefetch = 0 : i64, scratch_operands = 1 : i64, tpu.core_type = #tpu.core_type<tc>, window_params = [{transform_indices = @transform_0, window_bounds = array<i64: 2, 4, 256>}, {pipeline_mode = #tpu.pipeline_mode<synchronous>, transform_indices = @transform_1, window_bounds = array<i64: 4, 1>}, {pipeline_mode = #tpu.pipeline_mode<synchronous>, transform_indices = @transform_2, window_bounds = array<i64: 4, 1>}, {pipeline_mode = #tpu.pipeline_mode<synchronous>, transform_indices = @transform_3, window_bounds = array<i64: 4, 3>}, {pipeline_mode = #tpu.pipeline_mode<synchronous>, transform_indices = @transform_4, window_bounds = array<i64: 1, 3>}, {transform_indices = @transform_5, window_bounds = array<i64: 2, 3>}]} {
    %c0_i32 = arith.constant 0 : i32
    %0 = arith.cmpi eq, %arg1, %c0_i32 : i32
    %1 = arith.extui %0 : i1 to i32
    %c0_i32_0 = arith.constant 0 : i32
    %2 = arith.cmpi ne, %1, %c0_i32_0 : i32
    scf.if %2 {
      %cst_14 = arith.constant 0.000000e+00 : f32
      %21 = vector.broadcast %cst_14 : f32 to vector<2x4xf32>
      %c0_15 = arith.constant 0 : index
      %c0_16 = arith.constant 0 : index
      %22 = vector.load %arg8[%c0_15, %c0_16] : memref<2x4xf32, #tpu.memory_space<vmem>>, vector<2x4xf32>
      tpu.vector_store %arg8[%c0_15, %c0_16], %21 {strides = array<i32>} : memref<2x4xf32, #tpu.memory_space<vmem>>, vector<2x4xf32>,
    } else {
    }
    %c0 = arith.constant 0 : index
    %c0_1 = arith.constant 0 : index
    %c0_2 = arith.constant 0 : index
    %3 = vector.load %arg2[%c0, %c0_1, %c0_2] : memref<2x4x256xf32, #tpu.memory_space<vmem>>, vector<2x4x256xf32>
    %c0_3 = arith.constant 0 : index
    %c0_4 = arith.constant 0 : index
    %4 = vector.load %arg3[%c0_3, %c0_4] : memref<4x1xf32, #tpu.memory_space<vmem>>, vector<4x1xf32>
    %5 = vector.shape_cast %4 : vector<4x1xf32> to vector<1x4x1xf32>
    %c0_5 = arith.constant 0 : index
    %c0_6 = arith.constant 0 : index
    %6 = vector.load %arg4[%c0_5, %c0_6] : memref<4x1xf32, #tpu.memory_space<vmem>>, vector<4x1xf32>
    %7 = vector.shape_cast %6 : vector<4x1xf32> to vector<1x4x1xf32>
    %8 = vector.broadcast %5 : vector<1x4x1xf32> to vector<2x4x256xf32>
    %9 = arith.mulf %3, %8 : vector<2x4x256xf32>
    %10 = vector.broadcast %7 : vector<1x4x1xf32> to vector<2x4x256xf32>
    %11 = arith.addf %9, %10 : vector<2x4x256xf32>
    %cst = arith.constant 0.000000e+00 : f32
    %12 = vector.broadcast %cst : f32 to vector<2x4x256xf32>
    %13 = arith.maximumf %11, %12 : vector<2x4x256xf32>
    %c0_7 = arith.constant 0 : index
    %c0_8 = arith.constant 0 : index
    %14 = vector.load %arg8[%c0_7, %c0_8] : memref<2x4xf32, #tpu.memory_space<vmem>>, vector<2x4xf32>
    %cst_9 = arith.constant dense<0.000000e+00> : vector<2x4xf32>
    %15 = vector.multi_reduction <add>, %13, %cst_9 [2] : vector<2x4x256xf32> to vector<2x4xf32>
    %16 = arith.addf %14, %15 : vector<2x4xf32>
    %c0_10 = arith.constant 0 : index
    %c0_11 = arith.constant 0 : index
    %17 = vector.load %arg8[%c0_10, %c0_11] : memref<2x4xf32, #tpu.memory_space<vmem>>, vector<2x4xf32>
    tpu.vector_store %arg8[%c0_10, %c0_11], %16 {strides = array<i32>} : memref<2x4xf32, #tpu.memory_space<vmem>>, vector<2x4xf32>,
    %c0_i32_12 = arith.constant 0 : i32
    %18 = arith.cmpi eq, %arg1, %c0_i32_12 : i32
    %19 = arith.extui %18 : i1 to i32
    %c0_i32_13 = arith.constant 0 : i32
    %20 = arith.cmpi ne, %19, %c0_i32_13 : i32
    scf.if %20 {
      %c0_14 = arith.constant 0 : index
      %c0_15 = arith.constant 0 : index
      %21 = vector.load %arg8[%c0_14, %c0_15] : memref<2x4xf32, #tpu.memory_space<vmem>>, vector<2x4xf32>
      %c0_16 = arith.constant 0 : index
      %c0_17 = arith.constant 0 : index
      %22 = vector.load %arg5[%c0_16, %c0_17] : memref<4x3xf32, #tpu.memory_space<vmem>>, vector<4x3xf32>
      %cst_18 = arith.constant dense<0.000000e+00> : vector<2x3xf32>
      %23 = tpu.matmul %21, %22, %cst_18 {dimension_numbers = #tpu.dot_dimension_numbers<[1], [0], [0], [1], [0, 0, 1, 1], [], []>} : vector<2x4xf32>, vector<4x3xf32>, vector<2x3xf32> -> vector<2x3xf32>
      %c0_19 = arith.constant 0 : index
      %c0_20 = arith.constant 0 : index
      %24 = vector.load %arg6[%c0_19, %c0_20] : memref<1x3xf32, #tpu.memory_space<vmem>>, vector<1x3xf32>
      %25 = vector.broadcast %24 : vector<1x3xf32> to vector<2x3xf32>
      %26 = arith.addf %23, %25 : vector<2x3xf32>
      %c0_21 = arith.constant 0 : index
      %c0_22 = arith.constant 0 : index
      %27 = vector.load %arg7[%c0_21, %c0_22] : memref<2x3xf32, #tpu.memory_space<vmem>>, vector<2x3xf32>
      tpu.vector_store %arg7[%c0_21, %c0_22], %26 {strides = array<i32>} : memref<2x3xf32, #tpu.memory_space<vmem>>, vector<2x3xf32>,
    } else {
    }
    return
  }
  func.func @transform_0(%arg0: i32, %arg1: i32) -> (i32, i32, i32) {
    %c0_i32 = arith.constant 0 : i32
    %c0_i32_0 = arith.constant 0 : i32
    return %arg0, %c0_i32, %arg1 : i32, i32, i32
  }
  func.func @transform_1(%arg0: i32, %arg1: i32) -> (i32, i32) {
    %c0_i32 = arith.constant 0 : i32
    %c0_i32_0 = arith.constant 0 : i32
    %c0_i32_1 = arith.constant 0 : i32
    return %c0_i32, %c0_i32_0 : i32, i32
  }
  func.func @transform_2(%arg0: i32, %arg1: i32) -> (i32, i32) {
    %c0_i32 = arith.constant 0 : i32
    %c0_i32_0 = arith.constant 0 : i32
    %c0_i32_1 = arith.constant 0 : i32
    return %c0_i32, %c0_i32_0 : i32, i32
  }
  func.func @transform_3(%arg0: i32, %arg1: i32) -> (i32, i32) {
    %c0_i32 = arith.constant 0 : i32
    %c0_i32_0 = arith.constant 0 : i32
    %c0_i32_1 = arith.constant 0 : i32
    return %c0_i32, %c0_i32_0 : i32, i32
  }
  func.func @transform_4(%arg0: i32, %arg1: i32) -> (i32, i32) {
    %c0_i32 = arith.constant 0 : i32
    %c0_i32_0 = arith.constant 0 : i32
    %c0_i32_1 = arith.constant 0 : i32
    return %c0_i32, %c0_i32_0 : i32, i32
  }
  func.func @transform_5(%arg0: i32, %arg1: i32) -> (i32, i32) {
    %c0_i32 = arith.constant 0 : i32
    %c0_i32_0 = arith.constant 0 : i32
    return %arg0, %c0_i32 : i32, i32
  }
}

</mosaic_0001>

<bundles_post_ra>
// kernel: tpu_custom_call.1
= control target key start
LH: loop header
LB: loop body
LE: loop exit
PB: predicated region body
PF: predicated region fallthrough
CT: control target
= control target key end

     0   :  { %10 = vsyncpa [#allocation4], 0  ;;  %s365_s0 = inlined_call_operand.hbm [shape: f32[2,4,256], index: 0, kind: input, shape index: {}]   ;;  %s366_s1 = inlined_call_operand.vmem [shape: f32[4,1], index: 1, kind: input, shape index: {}]   ;;  %s367_s2 = inlined_call_operand.vmem [shape: f32[4,1], index: 2, kind: input, shape index: {}]   ;;  %s368_s3 = inlined_call_operand.vmem [shape: f32[4,3], index: 3, kind: input, shape index: {}]   ;;  %s369_s4 = inlined_call_operand.vmem [shape: f32[1,3], index: 4, kind: input, shape index: {}]   ;;  %s370_s5 = inlined_call_operand.hbm [shape: f32[2,3], index: 5, kind: output, shape index: {}]  }
   0x1   :  { %11 = vsyncpa [#allocation5], 0  ;;  %s284_s18 = smov [#allocation3]   ;;  %s236_s22 = scalar_lea.hbm %s365_s0, 256 }
   0x2   :  { %s17_s19 = sshll.u32 %s284_s18, 4  ;;  %p237_p0 = scmp.ne.s32.totalorder %s365_s0, %s236_s22  ;;  %s18_s19 = int_to_ptr.vmem [resolvable:$true] %s17_s19 }
   0x3   :  { %p240_p1 = scmp.lt.u32.totalorder %s236_s22, %s365_s0 }
   0x5   :  { %p242_p2 = pnand %p240_p1, %p237_p0 }
   0x7   :  { %245 = shalt.err (!%p242_p2)
}
   0x8   :  { %s246_s27 = scalar_lea.vmem %s18_s19, 256  ;;  %p251_p4 = scmp.lt.s32.totalorder %s18_s19, %s18_s19 }
   0x9   :  { %p247_p3 = scmp.ne.s32.totalorder %s18_s19, %s246_s27  ;;  %p252_p5 = scmp.lt.s32.totalorder %s246_s27, %s246_s27 }
   0xb   :  { %p253_p6 = por %p252_p5, %p251_p4 }
   0xd   :  { %p254_p7 = pnand %p253_p6, %p247_p3 }
   0xf   :  { %257 = shalt.err (!%p254_p7)
}
  0x10   :  { %s285_s28 = smov 128   ;;  %s286_s29 = smov 8  }
  0x11   :  { %23 = dma.hbm_to_vmem [thread:$0]  %s365_s0, 256, %s18_s19, [#allocation4], %s285_s28, %s285_s28, %s286_s29  }
  0x12   :  { %280 = dma.done.wait [#allocation4], 256  }
  0x13   :  { %281 = vsyncadd [#allocation4], 4294967040  ;;  %v287_v0 = vmov 0   ;;  %v43_v1 = vld [vmem:[%s366_s1] sm:$0xf]  ;;  %v52_v3 = vlaneseq  ;;  %v42_v14 = vld [vmem:[#allocation3 + $0x8] sm:$0xff] }
  0x14   :  { %235 = vset.pattern.permute.xlu0 %v287_v0  ;;  %v44_v2 = vld [vmem:[%s367_s2] sm:$0xf]  ;;  %v288_v7 = vmov 839922192   ;;  %vm82_vm0 = vcmask 1043456   ;;  %vm39_vm1 = vcmask 25600  }
  0x15   :  { %47 = vperm.xlu0 %235, %v43_v1   ;;  %v53_v4 = vshrl.u32 %v52_v3, 7  ;;  %v96_v5 = vand.u32 127, %v52_v3  ;;  %v50_v8 = vunpack.c.l.s4 %v288_v7  ;;  %v41_v13 = vld [vmem:[#allocation3] sm:$0xff]  ;;  %v289_v31 = vmov 0.0   ;;  %v217_v41 = vld [vmem:[%s369_s4] ss:$0 sm:$0xff] }
  0x16   :  { %40 = vst.msk [vmem:[#allocation2] sm:$0x3] %vm39_vm1, %v289_v31  ;;  %222 = vmatprep.subr.mxu0 %v289_v31  ;;  %v115_v32 = vld [vmem:[%s368_s3] sm:$0xf]  ;;  %vm290_vm2 = vmmov 0   ;;  %vm105_vm3 = vcmask 1041409  }
  0x17   :  { %v99_v6 = vsub.s32 %v96_v5, %v53_v4  ;;  %v51_v9 = vunpack.c.0.s8 %v50_v8  ;;  %223 = vmatpush3.msk.msra.mxu0 %vm82_vm0, %v115_v32  ;;  %224 = vmatprep.mubr.msk.f32.mxu0 %vm290_vm2, %v289_v31  ;;  %vm123_vm4 = vcmask 31744   ;;  %s291_s3 = smov [#allocation6]   ;;  %vm200_vm5 = vcmask 17408  }
  0x18   :  { %s208_s12 = sshll.u32 %s291_s3, 4  ;;  %s209_s12 = int_to_ptr.vmem [resolvable:$true] %s208_s12 }
  0x19   :  { %61 = vperm.xlu0 %235, %v44_v2   ;;  %v54_v10 = vsub.s32 %v51_v9, %v53_v4  ;;  %s258_s13 = scalar_lea.vmem %s209_s12, 32  ;;  %p263_p9 = scmp.lt.s32.totalorder %s209_s12, %s209_s12 }
  0x1a   :  { %p259_p8 = scmp.ne.s32.totalorder %s209_s12, %s258_s13  ;;  %p264_p10 = scmp.lt.s32.totalorder %s258_s13, %s258_s13 }
  0x1c   :  { %p265_p11 = por %p264_p10, %p263_p9 }
  0x1d   :  { %v75_v37 = vld [vmem:[#allocation2] sm:$0x3] }
  0x1e   :  { %p266_p12 = pnand %p265_p11, %p259_p8 }
  0x94   :  { %v48_v11 = vpop.permute.xlu0 %47 }
  0x95   :  { %v55_v12 = vrot.slane %v48_v11, %v54_v10 }
  0x97   :  { %v57_v16 = vmul.f32 %v55_v12, %v41_v13  ;;  %v58_v17 = vmul.f32 %v55_v12, %v42_v14 }
  0x98   :  { %v62_v15 = vpop.permute.xlu0 %61 }
  0x99   :  { %v69_v18 = vrot.slane %v62_v15, %v54_v10 }
  0x9b   :  { %v71_v19 = vadd.f32 %v69_v18, %v57_v16  ;;  %v72_v20 = vadd.f32 %v69_v18, %v58_v17 }
  0x9d   :  { %v74_v21 = vmax.f32 %v72_v20, 0.0  ;;  %v73_v22 = vmax.f32 %v71_v19, 0.0 }
  0x9f   :  { %v78_v23 = vcombine.high %v73_v22, %v73_v22  ;;  %v79_v24 = vcombine.high %v74_v21, %v74_v21  ;;  %v83_v25 = vsel %vm82_vm0, %v73_v22, 0.0  ;;  %v88_v29 = vsel %vm82_vm0, %v74_v21, 0.0 }
  0xa1   :  { %v84_v26 = vsel %vm82_vm0, %v78_v23, 0.0  ;;  %v89_v28 = vsel %vm82_vm0, %v79_v24, 0.0 }
  0xa2   :  { %v85_v27 = vadd.f32 %v84_v26, %v83_v25  ;;  %v90_v30 = vadd.f32 %v89_v28, %v88_v29 }
  0xa4   :  { %86 = vadd.xlane.f32.xlu1 %v85_v27 }
  0xa8   :  { %91 = vadd.xlane.f32.xlu1 %v90_v30 }
 0x131   :  { %v87_v33 = vpop.xlane.xlu1 %86 }
 0x132   :  { %v100_v35 = vrot.slane %v87_v33, %v99_v6 }
 0x135   :  { %v92_v34 = vpop.xlane.xlu1 %91 }
 0x136   :  { %v104_v36 = vrot.slane %v92_v34, %v99_v6 }
 0x138   :  { %v106_v38 = vsel %vm105_vm3, %v104_v36, %v100_v35 }
 0x139   :  { %v108_v39 = vadd.f32 %v106_v38, %v75_v37 }
 0x13b   :  { %110 = vst.msk [vmem:[#allocation2] sm:$0x3] %vm39_vm1, %v108_v39 }
 0x142   :  { %v114_v40 = vld [vmem:[#allocation2] sm:$0x3] }
 0x143   :  { %225 = vmatmul.mubr.msk.f32.vlgmr.msra.gmra.mrb[0].mxu0 %vm123_vm4, %v114_v40 }
 0x216   :  { %v196_v42 = vpop.f32.mrb[0].mxu0 }
 0x217   :  { %v197_v43 = vadd.f32 %v217_v41, %v196_v42  ;;  %v226_v44 = vpop.f32.mrb[1].mxu0 }
 0x219   :  { %201 = vst.msk [vmem:[#allocation6] sm:$0x3] %vm200_vm5, %v197_v43 }
 0x21a   :  { %269 = shalt.err (!%p266_p12)
}
 0x21b   :  { %s270_s16 = scalar_lea.hbm %s370_s5, 32 }
 0x21c   :  { %p271_p13 = scmp.ne.s32.totalorder %s370_s5, %s270_s16  ;;  %p274_p0 = scmp.lt.u32.totalorder %s270_s16, %s370_s5 }
 0x21e   :  { %p276_p1 = pnand %p274_p0, %p271_p13 }
 0x220   :  { %279 = shalt.err (!%p276_p1)
}
 0x221   :  { %211 = dma.vmem_to_hbm [thread:$0]  %s209_s12, 32, %s370_s5, [#allocation5]  }
 0x222   :  { %282 = dma.done.wait [#allocation5], 32  }
 0x223   :  { %283 = vsyncadd [#allocation5], 4294967264 }
 0x224   :  { %215 = vsyncpa [#allocation4], 1 }
 0x225   :  { %216 = vsyncpa [#allocation5], 1 }

</bundles_post_ra>
